<compile_context>
chip_gen: v5e
topology: v5e:2x2
jax: 0.10.0
libtpu: 0.0.40
codegen_flags: <defaults>
</compile_context>

<pallas_src>
import jax
import jax.numpy as jnp
from jax.experimental import pallas as pl
from jax.experimental.pallas import tpu as pltpu

# Logical (PyTorch) dims.
X_SIZE = 784   # kept unpadded: 784 is sublane-aligned; MXU pads K internally
H_DIM = 200
Y_DIM = 10

# TPU-padded output/hidden dims (lane-aligned multiples of 128).
H_PAD = 256   # 200 -> 256
Y_PAD = 128   # 10  -> 128 (lane-dense unmasked stores)

DEFAULT_TILE_B = 1024  # batch rows per grid step


def _round_up(n, m):
    return ((n + m - 1) // m) * m


def _mlp_kernel(x_ref, w1_ref, b1_ref, w2_ref, b2_ref, w3_ref, b3_ref, o_ref):
    """One batch tile: 3 MXU matmuls (bf16 in, f32 acc) + ReLU + log_softmax."""
    x = x_ref[...]                                               # (TB, 784) bf16

    # Layer 1: Linear + ReLU (epilogue in f32)
    h1 = jnp.dot(x, w1_ref[...], preferred_element_type=jnp.float32) + b1_ref[...]
    h1 = jnp.maximum(h1, 0.0).astype(jnp.bfloat16)               # (TB, H_PAD)

    # Layer 2: Linear + ReLU
    h2 = jnp.dot(h1, w2_ref[...], preferred_element_type=jnp.float32) + b2_ref[...]
    h2 = jnp.maximum(h2, 0.0).astype(jnp.bfloat16)               # (TB, H_PAD)

    # Layer 3: Linear (logits), padded to Y_PAD lanes for a lane-dense store.
    logits = jnp.dot(h2, w3_ref[...], preferred_element_type=jnp.float32) + b3_ref[...]

    # Mask padded logit columns so they cannot affect max / sum-exp.
    # (Python float literal -> no captured constant.)
    col = jax.lax.broadcasted_iota(jnp.int32, logits.shape, 1)
    logits = jnp.where(col < Y_DIM, logits, -1e30)

    # Numerically-stable log_softmax over dim=1 (f32 throughout).
    m = jnp.max(logits, axis=1, keepdims=True)
    shifted = logits - m
    lse = jnp.log(jnp.sum(jnp.exp(shifted), axis=1, keepdims=True))
    o_ref[...] = shifted - lse


def prepare_params(w1, b1, w2, b2, w3, b3):
    """Pad once (call at init, NOT per forward). Weights -> bf16, biases f32 (1, N)."""
    w1p = jnp.zeros((X_SIZE, H_PAD), jnp.bfloat16).at[:, :H_DIM].set(
        w1.astype(jnp.bfloat16))
    b1p = jnp.zeros((1, H_PAD), jnp.float32).at[:, :H_DIM].set(b1.astype(jnp.float32))
    w2p = jnp.zeros((H_PAD, H_PAD), jnp.bfloat16).at[:H_DIM, :H_DIM].set(
        w2.astype(jnp.bfloat16))
    b2p = jnp.zeros((1, H_PAD), jnp.float32).at[:, :H_DIM].set(b2.astype(jnp.float32))
    w3p = jnp.zeros((H_PAD, Y_PAD), jnp.bfloat16).at[:H_DIM, :Y_DIM].set(
        w3.astype(jnp.bfloat16))
    b3p = jnp.zeros((1, Y_PAD), jnp.float32).at[:, :Y_DIM].set(b3.astype(jnp.float32))
    return w1p, b1p, w2p, b2p, w3p, b3p


def mlp_forward(x, w1p, b1p, w2p, b2p, w3p, b3p, *, tile_b=DEFAULT_TILE_B):
    """Forward pass.

    x: (B, 784), any float dtype. Params must already be padded via
    prepare_params (hoisted out of the per-call path). Returns (B, 10) f32
    log-probabilities.
    """
    B = x.shape[0]

    # Batch tile: multiple of 16 (bf16 sublane packing); don't over-pad tiny
    # batches, but cap at tile_b.
    tb = min(tile_b, _round_up(max(B, 16), 16))
    Bp = _round_up(B, tb)

    # v7x megacore: ensure >= 2 grid steps when the batch allows so the
    # "parallel" batch axis actually shards across both TensorCores.
    if Bp // tb < 2 and B > 16:
        tb = _round_up((B + 1) // 2, 16)
        Bp = _round_up(B, tb)

    # Minimal wrapper work: bf16 cast fused with a batch-only zero pad.
    # Padded rows produce bias-only logits and are sliced off below.
    xb = x.astype(jnp.bfloat16)
    if Bp != B:
        xb = jnp.pad(xb, ((0, Bp - B), (0, 0)))

    grid = (Bp // tb,)

    def resident(shape):
        # Constant block index -> DMA'd once, stays resident in VMEM.
        return pl.BlockSpec(shape, lambda i: (0, 0))

    out = pl.pallas_call(
        _mlp_kernel,
        out_shape=jax.ShapeDtypeStruct((Bp, Y_PAD), jnp.float32),
        grid=grid,
        in_specs=[
            pl.BlockSpec((tb, X_SIZE), lambda i: (i, 0)),  # x tile (pipelined)
            resident((X_SIZE, H_PAD)),                     # w1
            resident((1, H_PAD)),                          # b1
            resident((H_PAD, H_PAD)),                      # w2
            resident((1, H_PAD)),                          # b2
            resident((H_PAD, Y_PAD)),                      # w3
            resident((1, Y_PAD)),                          # b3
        ],
        out_specs=pl.BlockSpec((tb, Y_PAD), lambda i: (i, 0)),
        compiler_params=pltpu.CompilerParams(
            dimension_semantics=("parallel",),             # megacore on v7x
        ),
    )(xb, w1p, b1p, w2p, b2p, w3p, b3p)

    return out[:B, :Y_DIM]


def init_params(key):
    """Deterministic parameter init (PyTorch-Linear-like uniform bounds),
    at the original (unpadded) logical shapes, f32."""
    ks = jax.random.split(key, 6)

    def lin(kw, kb, fan_in, fan_out):
        bound = 1.0 / jnp.sqrt(fan_in)
        w = jax.random.uniform(kw, (fan_in, fan_out), jnp.float32, -bound, bound)
        b = jax.random.uniform(kb, (1, fan_out), jnp.float32, -bound, bound)
        return w, b

    w1, b1 = lin(ks[0], ks[1], X_SIZE, H_DIM)
    w2, b2 = lin(ks[2], ks[3], H_DIM, H_DIM)
    w3, b3 = lin(ks[4], ks[5], H_DIM, Y_DIM)
    return w1, b1, w2, b2, w3, b3


def _reference_forward(x, w1, b1, w2, b2, w3, b3):
    """Pure-JAX f32 reference for correctness checking."""
    h1 = jnp.maximum(x @ w1 + b1, 0.0)
    h2 = jnp.maximum(h1 @ w2 + b2, 0.0)
    logits = h2 @ w3 + b3
    return jax.nn.log_softmax(logits, axis=1)


if __name__ == "__main__":
    key = jax.random.PRNGKey(0)
    k_x, k_p = jax.random.split(key)

    B = 8  # small demo batch
    x = jax.random.normal(k_x, (B, X_SIZE), dtype=jnp.float32)
    params = init_params(k_p)

    # Pad/convert weights ONCE (hoisted out of the forward call).
    padded_params = prepare_params(*params)

    out = mlp_forward(x, *padded_params)
    out = jax.block_until_ready(out)

    # sanity: shape, rows (log-)sum to ~1 after exp, and matches an f32
    # reference (loose tolerance: kernel uses bf16 x and bf16 weights with
    # f32 accumulation).
    assert out.shape == (B, Y_DIM)
    row_sums = jnp.sum(jnp.exp(out), axis=1)
    assert jnp.allclose(row_sums, 1.0, atol=1e-5)

    ref = _reference_forward(x, *params)
    assert jnp.allclose(out, ref, atol=1e-1), float(jnp.max(jnp.abs(out - ref)))

    print("KERNEL_OK")
</pallas_src>

<mosaic_0001>
module attributes {stable_mosaic.version = 11 : i64} {
  func.func @_mlp_kernel(%arg0: i32, %arg1: memref<16x784xbf16, #tpu.memory_space<vmem>>, %arg2: memref<784x256xbf16, #tpu.memory_space<vmem>>, %arg3: memref<1x256xf32, #tpu.memory_space<vmem>>, %arg4: memref<256x256xbf16, #tpu.memory_space<vmem>>, %arg5: memref<1x256xf32, #tpu.memory_space<vmem>>, %arg6: memref<256x128xbf16, #tpu.memory_space<vmem>>, %arg7: memref<1x128xf32, #tpu.memory_space<vmem>>, %arg8: memref<16x128xf32, #tpu.memory_space<vmem>>) attributes {dimension_semantics = [#tpu.dimension_semantics<parallel>], iteration_bounds = array<i64: 1>, scalar_prefetch = 0 : i64, scratch_operands = 0 : i64, tpu.core_type = #tpu.core_type<tc>, window_params = [{transform_indices = @transform_0, window_bounds = array<i64: 16, 784>}, {pipeline_mode = #tpu.pipeline_mode<synchronous>, transform_indices = @transform_1, window_bounds = array<i64: 784, 256>}, {pipeline_mode = #tpu.pipeline_mode<synchronous>, transform_indices = @transform_2, window_bounds = array<i64: 1, 256>}, {pipeline_mode = #tpu.pipeline_mode<synchronous>, transform_indices = @transform_3, window_bounds = array<i64: 256, 256>}, {pipeline_mode = #tpu.pipeline_mode<synchronous>, transform_indices = @transform_4, window_bounds = array<i64: 1, 256>}, {pipeline_mode = #tpu.pipeline_mode<synchronous>, transform_indices = @transform_5, window_bounds = array<i64: 256, 128>}, {pipeline_mode = #tpu.pipeline_mode<synchronous>, transform_indices = @transform_6, window_bounds = array<i64: 1, 128>}, {transform_indices = @transform_7, window_bounds = array<i64: 16, 128>}]} {
    %c0 = arith.constant 0 : index
    %c0_0 = arith.constant 0 : index
    %0 = vector.load %arg1[%c0, %c0_0] : memref<16x784xbf16, #tpu.memory_space<vmem>>, vector<16x784xbf16>
    %c0_1 = arith.constant 0 : index
    %c0_2 = arith.constant 0 : index
    %1 = vector.load %arg2[%c0_1, %c0_2] : memref<784x256xbf16, #tpu.memory_space<vmem>>, vector<784x256xbf16>
    %cst = arith.constant dense<0.000000e+00> : vector<16x256xf32>
    %2 = tpu.matmul %0, %1, %cst {dimension_numbers = #tpu.dot_dimension_numbers<[1], [0], [0], [1], [0, 0, 1, 1], [], []>} : vector<16x784xbf16>, vector<784x256xbf16>, vector<16x256xf32> -> vector<16x256xf32>
    %c0_3 = arith.constant 0 : index
    %c0_4 = arith.constant 0 : index
    %3 = vector.load %arg3[%c0_3, %c0_4] : memref<1x256xf32, #tpu.memory_space<vmem>>, vector<1x256xf32>
    %4 = vector.broadcast %3 : vector<1x256xf32> to vector<16x256xf32>
    %5 = arith.addf %2, %4 : vector<16x256xf32>
    %cst_5 = arith.constant 0.000000e+00 : f32
    %6 = vector.broadcast %cst_5 : f32 to vector<16x256xf32>
    %7 = arith.maximumf %5, %6 : vector<16x256xf32>
    %8 = arith.truncf %7 : vector<16x256xf32> to vector<16x256xbf16>
    %c0_6 = arith.constant 0 : index
    %c0_7 = arith.constant 0 : index
    %9 = vector.load %arg4[%c0_6, %c0_7] : memref<256x256xbf16, #tpu.memory_space<vmem>>, vector<256x256xbf16>
    %cst_8 = arith.constant dense<0.000000e+00> : vector<16x256xf32>
    %10 = tpu.matmul %8, %9, %cst_8 {dimension_numbers = #tpu.dot_dimension_numbers<[1], [0], [0], [1], [0, 0, 1, 1], [], []>} : vector<16x256xbf16>, vector<256x256xbf16>, vector<16x256xf32> -> vector<16x256xf32>
    %c0_9 = arith.constant 0 : index
    %c0_10 = arith.constant 0 : index
    %11 = vector.load %arg5[%c0_9, %c0_10] : memref<1x256xf32, #tpu.memory_space<vmem>>, vector<1x256xf32>
    %12 = vector.broadcast %11 : vector<1x256xf32> to vector<16x256xf32>
    %13 = arith.addf %10, %12 : vector<16x256xf32>
    %cst_11 = arith.constant 0.000000e+00 : f32
    %14 = vector.broadcast %cst_11 : f32 to vector<16x256xf32>
    %15 = arith.maximumf %13, %14 : vector<16x256xf32>
    %16 = arith.truncf %15 : vector<16x256xf32> to vector<16x256xbf16>
    %c0_12 = arith.constant 0 : index
    %c0_13 = arith.constant 0 : index
    %17 = vector.load %arg6[%c0_12, %c0_13] : memref<256x128xbf16, #tpu.memory_space<vmem>>, vector<256x128xbf16>
    %cst_14 = arith.constant dense<0.000000e+00> : vector<16x128xf32>
    %18 = tpu.matmul %16, %17, %cst_14 {dimension_numbers = #tpu.dot_dimension_numbers<[1], [0], [0], [1], [0, 0, 1, 1], [], []>} : vector<16x256xbf16>, vector<256x128xbf16>, vector<16x128xf32> -> vector<16x128xf32>
    %c0_15 = arith.constant 0 : index
    %c0_16 = arith.constant 0 : index
    %19 = vector.load %arg7[%c0_15, %c0_16] : memref<1x128xf32, #tpu.memory_space<vmem>>, vector<1x128xf32>
    %20 = vector.broadcast %19 : vector<1x128xf32> to vector<16x128xf32>
    %21 = arith.addf %18, %20 : vector<16x128xf32>
    %22 = tpu.iota {dimensions = array<i32: 1>} : vector<16x128xi32>
    %c10_i32 = arith.constant 10 : i32
    %23 = vector.broadcast %c10_i32 : i32 to vector<16x128xi32>
    %24 = arith.cmpi slt, %22, %23 : vector<16x128xi32>
    %cst_17 = arith.constant -1.000000e+30 : f32
    %25 = vector.broadcast %cst_17 : f32 to vector<16x128xf32>
    %26 = arith.select %24, %21, %25 : vector<16x128xi1>, vector<16x128xf32>
    %cst_18 = arith.constant dense<0xFF800000> : vector<16xf32>
    %27 = vector.multi_reduction <maximumf>, %26, %cst_18 [1] : vector<16x128xf32> to vector<16xf32>
    %28 = vector.shape_cast %27 : vector<16xf32> to vector<16x1xf32>
    %29 = vector.broadcast %28 : vector<16x1xf32> to vector<16x128xf32>
    %30 = arith.subf %26, %29 : vector<16x128xf32>
    %31 = math.exp %30 : vector<16x128xf32>
    %cst_19 = arith.constant dense<0.000000e+00> : vector<16xf32>
    %32 = vector.multi_reduction <add>, %31, %cst_19 [1] : vector<16x128xf32> to vector<16xf32>
    %33 = vector.shape_cast %32 : vector<16xf32> to vector<16x1xf32>
    %34 = math.log %33 : vector<16x1xf32>
    %35 = vector.broadcast %34 : vector<16x1xf32> to vector<16x128xf32>
    %36 = arith.subf %30, %35 : vector<16x128xf32>
    %c0_20 = arith.constant 0 : index
    %c0_21 = arith.constant 0 : index
    %37 = vector.load %arg8[%c0_20, %c0_21] : memref<16x128xf32, #tpu.memory_space<vmem>>, vector<16x128xf32>
    tpu.vector_store %arg8[%c0_20, %c0_21], %36 {strides = array<i32>} : memref<16x128xf32, #tpu.memory_space<vmem>>, vector<16x128xf32>,
    return
  }
  func.func @transform_0(%arg0: i32) -> (i32, i32) {
    %c0_i32 = arith.constant 0 : i32
    %c0_i32_0 = arith.constant 0 : i32
    return %arg0, %c0_i32 : i32, i32
  }
  func.func @transform_1(%arg0: i32) -> (i32, i32) {
    %c0_i32 = arith.constant 0 : i32
    %c0_i32_0 = arith.constant 0 : i32
    %c0_i32_1 = arith.constant 0 : i32
    return %c0_i32, %c0_i32_0 : i32, i32
  }
  func.func @transform_2(%arg0: i32) -> (i32, i32) {
    %c0_i32 = arith.constant 0 : i32
    %c0_i32_0 = arith.constant 0 : i32
    %c0_i32_1 = arith.constant 0 : i32
    return %c0_i32, %c0_i32_0 : i32, i32
  }
  func.func @transform_3(%arg0: i32) -> (i32, i32) {
    %c0_i32 = arith.constant 0 : i32
    %c0_i32_0 = arith.constant 0 : i32
    %c0_i32_1 = arith.constant 0 : i32
    return %c0_i32, %c0_i32_0 : i32, i32
  }
  func.func @transform_4(%arg0: i32) -> (i32, i32) {
    %c0_i32 = arith.constant 0 : i32
    %c0_i32_0 = arith.constant 0 : i32
    %c0_i32_1 = arith.constant 0 : i32
    return %c0_i32, %c0_i32_0 : i32, i32
  }
  func.func @transform_5(%arg0: i32) -> (i32, i32) {
    %c0_i32 = arith.constant 0 : i32
    %c0_i32_0 = arith.constant 0 : i32
    %c0_i32_1 = arith.constant 0 : i32
    return %c0_i32, %c0_i32_0 : i32, i32
  }
  func.func @transform_6(%arg0: i32) -> (i32, i32) {
    %c0_i32 = arith.constant 0 : i32
    %c0_i32_0 = arith.constant 0 : i32
    %c0_i32_1 = arith.constant 0 : i32
    return %c0_i32, %c0_i32_0 : i32, i32
  }
  func.func @transform_7(%arg0: i32) -> (i32, i32) {
    %c0_i32 = arith.constant 0 : i32
    %c0_i32_0 = arith.constant 0 : i32
    return %arg0, %c0_i32 : i32, i32
  }
}

</mosaic_0001>

<bundles_post_ra>
// kernel: tpu_custom_call.1
= control target key start
LH: loop header
LB: loop body
LE: loop exit
PB: predicated region body
PF: predicated region fallthrough
CT: control target
= control target key end

     0   :  { %12 = vsyncpa [#allocation3], 0  ;;  %s2474_s0 = inlined_call_operand.hbm [shape: bf16[16,784], index: 0, kind: input, shape index: {}]   ;;  %s2475_s1 = inlined_call_operand.hbm [shape: bf16[784,256], index: 1, kind: input, shape index: {}]   ;;  %s2476_s2 = inlined_call_operand.hbm [shape: f32[1,256], index: 2, kind: input, shape index: {}]   ;;  %s2477_s3 = inlined_call_operand.hbm [shape: bf16[256,256], index: 3, kind: input, shape index: {}]   ;;  %s2478_s4 = inlined_call_operand.vmem [shape: f32[1,256], index: 4, kind: input, shape index: {}]   ;;  %s2479_s5 = inlined_call_operand.hbm [shape: bf16[256,128], index: 5, kind: input, shape index: {}]   ;;  %s2480_s6 = inlined_call_operand.vmem [shape: f32[1,128], index: 6, kind: input, shape index: {}]   ;;  %s2481_s7 = inlined_call_operand.hbm [shape: f32[16,128], index: 7, kind: output, shape index: {}]  }
   0x1   :  { %13 = vsyncpa [#allocation6], 0 }
   0x2   :  { %14 = vsyncpa [#allocation9], 0  ;;  %s33_s26 = sshll.u32 %s2475_s1, 4  ;;  %s34_s26 = int_to_ptr.hbm [resolvable:$true] %s33_s26 }
   0x3   :  { %15 = vsyncpa [#allocation4], 0  ;;  %s2355_s27 = smov [#allocation5]   ;;  %s57_s8 = sshll.u32 %s2477_s3, 4  ;;  %s58_s8 = int_to_ptr.hbm [resolvable:$true] %s57_s8 }
   0x4   :  { %s35_s28 = sshll.u32 %s2355_s27, 4  ;;  %s2356_s9 = smov 128   ;;  %s36_s28 = int_to_ptr.vmem [resolvable:$true] %s35_s28 }
   0x5   :  { %s2357_s10 = smov 8   ;;  %s2358_s11 = smov [#allocation8]  }
   0x6   :  { %41 = dma.hbm_to_vmem [thread:$0]  %s34_s26, 12544, %s36_s28, [#allocation6], %s2356_s9, %s2356_s9, %s2357_s10  }
   0x7   :  { %s59_s12 = sshll.u32 %s2358_s11, 4  ;;  %s20_s14 = sshll.u32 %s2474_s0, 4  ;;  %s60_s12 = int_to_ptr.vmem [resolvable:$true] %s59_s12  ;;  %s21_s14 = int_to_ptr.hbm [resolvable:$true] %s20_s14 }
   0x8   :  { %65 = dma.hbm_to_vmem [thread:$0]  %s58_s8, 4096, %s60_s12, [#allocation9], %s2356_s9, %s2356_s9, %s2357_s10  }
   0x9   :  { %s2359_s3 = smov [#allocation2]   ;;  %s47_s18 = sshll.u32 %s2476_s2, 4  ;;  %s48_s18 = int_to_ptr.hbm [resolvable:$true] %s47_s18 }
   0xa   :  { %s22_s15 = sshll.u32 %s2359_s3, 4  ;;  %s2360_s19 = smov 448   ;;  %s23_s15 = int_to_ptr.vmem [resolvable:$true] %s22_s15 }
   0xb   :  { %s2361_s20 = smov 28   ;;  %s2362_s21 = smov [#allocation7]  }
   0xc   :  { %28 = dma.hbm_to_vmem [thread:$0]  %s21_s14, 896, %s23_s15, [#allocation3], %s2360_s19, %s2360_s19, %s2361_s20  }
   0xd   :  { %s49_s22 = sshll.u32 %s2362_s21, 4  ;;  %s72_s24 = sshll.u32 %s2479_s5, 4  ;;  %s50_s22 = int_to_ptr.vmem [resolvable:$true] %s49_s22  ;;  %s73_s24 = int_to_ptr.hbm [resolvable:$true] %s72_s24 }
   0xe   :  { %52 = dma.hbm_to_vmem [thread:$0]  %s48_s18, 32, %s50_s22, [#allocation6]  }
   0xf   :  { %s2363_s25 = smov [#allocation10]   ;;  %s2364_s27 = smov 64  }
  0x10   :  { %s74_s26 = sshll.u32 %s2363_s25, 4  ;;  %s2365_s28 = smov 4   ;;  %s75_s26 = int_to_ptr.vmem [resolvable:$true] %s74_s26 }
  0x11   :  { %80 = dma.hbm_to_vmem [thread:$0]  %s73_s24, 2048, %s75_s26, [#allocation9], %s2364_s27, %s2364_s27, %s2365_s28  }
  0x12   :  { %2347 = dma.done.wait [#allocation3], 896  }
  0x13   :  { %2348 = vsyncadd [#allocation3], 4294966400 }
  0x14   :  { %2349 = dma.done.wait [#allocation6], 12576  }
  0x15   :  { %2350 = vsyncadd [#allocation6], 4294954720 }
  0x16   :  { %2351 = dma.done.wait [#allocation9], 6144  }
  0x17   :  { %2352 = vsyncadd [#allocation9], 4294961152  ;;  %v1501_v0 = vld [vmem:[#allocation5 + $0x70] sm:$0xf]  ;;  %v2051_v1 = vld [vmem:[#allocation5 + $0x74] sm:$0xf0] }
  0x18   :  { %v1629_v2 = vld [vmem:[#allocation5 + $0x170] sm:$0xf]  ;;  %v1502_v3 = vor.u32 %v2051_v1, %v1501_v0  ;;  %v2083_v4 = vld [vmem:[#allocation5 + $0x174] sm:$0xf0]  ;;  %v1493_v11 = vld [vmem:[#allocation5 + $0x60] sm:$0xf] }
  0x19   :  { %v1693_v5 = vld [vmem:[#allocation5 + $0x1f0] sm:$0xf]  ;;  %v2099_v6 = vld [vmem:[#allocation5 + $0x1f4] sm:$0xf0]  ;;  %v1630_v7 = vor.u32 %v2083_v4, %v1629_v2  ;;  %v2049_v13 = vld [vmem:[#allocation5 + $0x64] sm:$0xf0] }
  0x1a   :  { %v1694_v8 = vor.u32 %v2099_v6, %v1693_v5  ;;  %v1565_v9 = vld [vmem:[#allocation5 + $0xf0] sm:$0xf]  ;;  %v2067_v10 = vld [vmem:[#allocation5 + $0xf4] sm:$0xf0]  ;;  %745 = vmatpush.bf16.msra.mxu0 %v1502_v3  ;;  %v1621_v14 = vld [vmem:[#allocation5 + $0x160] sm:$0xf]  ;;  %v1494_v16 = vor.u32 %v2049_v13, %v1493_v11 }
  0x1b   :  { %v1566_v12 = vor.u32 %v2067_v10, %v1565_v9  ;;  %v2081_v15 = vld [vmem:[#allocation5 + $0x164] sm:$0xf0]  ;;  %773 = vmatpush.bf16.msra.mxu2 %v1630_v7  ;;  %v1685_v18 = vld [vmem:[#allocation5 + $0x1e0] sm:$0xf]  ;;  %v1485_v23 = vld [vmem:[#allocation5 + $0x50] sm:$0xf] }
  0x1c   :  { %787 = vmatpush.bf16.msra.mxu3 %v1694_v8  ;;  %v1622_v17 = vor.u32 %v2081_v15, %v1621_v14  ;;  %v2097_v19 = vld [vmem:[#allocation5 + $0x1e4] sm:$0xf0]  ;;  %v1557_v20 = vld [vmem:[#allocation5 + $0xe0] sm:$0xf]  ;;  %v2047_v24 = vld [vmem:[#allocation5 + $0x54] sm:$0xf0] }
  0x1d   :  { %759 = vmatpush.bf16.msra.mxu1 %v1566_v12  ;;  %v1686_v21 = vor.u32 %v2097_v19, %v1685_v18  ;;  %v2065_v22 = vld [vmem:[#allocation5 + $0xe4] sm:$0xf0]  ;;  %v1613_v26 = vld [vmem:[#allocation5 + $0x150] sm:$0xf]  ;;  %v2079_v27 = vld [vmem:[#allocation5 + $0x154] sm:$0xf0]  ;;  %v1486_v29 = vor.u32 %v2047_v24, %v1485_v23 }
  0x1e   :  { %v1558_v25 = vor.u32 %v2065_v22, %v1557_v20  ;;  %v1677_v28 = vld [vmem:[#allocation5 + $0x1d0] sm:$0xf]  ;;  %746 = vmatpush.bf16.msra.mxu0 %v1494_v16  ;;  %v2095_v30 = vld [vmem:[#allocation5 + $0x1d4] sm:$0xf0]  ;;  %v1614_v33 = vor.u32 %v2079_v27, %v1613_v26  ;;  %v1477_v35 = vld [vmem:[#allocation5 + $0x40] sm:$0xf] }
  0x1f   :  { %v1549_v31 = vld [vmem:[#allocation5 + $0xd0] sm:$0xf]  ;;  %v2063_v32 = vld [vmem:[#allocation5 + $0xd4] sm:$0xf0]  ;;  %774 = vmatpush.bf16.msra.mxu2 %v1622_v17  ;;  %v1678_v34 = vor.u32 %v2095_v30, %v1677_v28  ;;  %v2045_v36 = vld [vmem:[#allocation5 + $0x44] sm:$0xf0] }
  0x20   :  { %788 = vmatpush.bf16.msra.mxu3 %v1686_v21  ;;  %v1605_v37 = vld [vmem:[#allocation5 + $0x140] sm:$0xf]  ;;  %v1550_v38 = vor.u32 %v2063_v32, %v1549_v31  ;;  %v2077_v39 = vld [vmem:[#allocation5 + $0x144] sm:$0xf0]  ;;  %v1478_v44 = vor.u32 %v2045_v36, %v1477_v35  ;;  %v1469_v47 = vld [vmem:[#allocation5 + $0x30] sm:$0xf] }
  0x21   :  { %760 = vmatpush.bf16.msra.mxu1 %v1558_v25  ;;  %v1669_v40 = vld [vmem:[#allocation5 + $0x1c0] sm:$0xf]  ;;  %v2093_v41 = vld [vmem:[#allocation5 + $0x1c4] sm:$0xf0]  ;;  %v1606_v45 = vor.u32 %v2077_v39, %v1605_v37  ;;  %v2043_v48 = vld [vmem:[#allocation5 + $0x34] sm:$0xf0] }
  0x22   :  { %v1541_v42 = vld [vmem:[#allocation5 + $0xc0] sm:$0xf]  ;;  %v2061_v43 = vld [vmem:[#allocation5 + $0xc4] sm:$0xf0]  ;;  %747 = vmatpush.bf16.msra.mxu0 %v1486_v29  ;;  %v1670_v46 = vor.u32 %v2093_v41, %v1669_v40  ;;  %v1597_v49 = vld [vmem:[#allocation5 + $0x130] sm:$0xf]  ;;  %v1470_v56 = vor.u32 %v2043_v48, %v1469_v47 }
  0x23   :  { %775 = vmatpush.bf16.msra.mxu2 %v1614_v33  ;;  %v1542_v50 = vor.u32 %v2061_v43, %v1541_v42  ;;  %v2075_v51 = vld [vmem:[#allocation5 + $0x134] sm:$0xf0]  ;;  %v1661_v52 = vld [vmem:[#allocation5 + $0x1b0] sm:$0xf]  ;;  %v1461_v59 = vld [vmem:[#allocation5 + $0x20] sm:$0xf] }
  0x24   :  { %789 = vmatpush.bf16.msra.mxu3 %v1678_v34  ;;  %v2091_v53 = vld [vmem:[#allocation5 + $0x1b4] sm:$0xf0]  ;;  %v1533_v54 = vld [vmem:[#allocation5 + $0xb0] sm:$0xf]  ;;  %v1598_v57 = vor.u32 %v2075_v51, %v1597_v49  ;;  %v2041_v60 = vld [vmem:[#allocation5 + $0x24] sm:$0xf0] }
  0x25   :  { %761 = vmatpush.bf16.msra.mxu1 %v1550_v38  ;;  %v2059_v55 = vld [vmem:[#allocation5 + $0xb4] sm:$0xf0]  ;;  %v1662_v58 = vor.u32 %v2091_v53, %v1661_v52  ;;  %v1589_v61 = vld [vmem:[#allocation5 + $0x120] sm:$0xf]  ;;  %v2073_v63 = vld [vmem:[#allocation5 + $0x124] sm:$0xf0]  ;;  %v1462_v4 = vor.u32 %v2041_v60, %v1461_v59 }
  0x26   :  { %748 = vmatpush.bf16.msra.mxu0 %v1478_v44  ;;  %v1534_v62 = vor.u32 %v2059_v55, %v1533_v54  ;;  %v1653_v0 = vld [vmem:[#allocation5 + $0x1a0] sm:$0xf]  ;;  %v2089_v1 = vld [vmem:[#allocation5 + $0x1a4] sm:$0xf0]  ;;  %v1453_v5 = vld [vmem:[#allocation5 + $0x10] sm:$0xf]  ;;  %v1590_v6 = vor.u32 %v2073_v63, %v1589_v61 }
  0x27   :  { %776 = vmatpush.bf16.msra.mxu2 %v1606_v45  ;;  %v1525_v2 = vld [vmem:[#allocation5 + $0xa0] sm:$0xf]  ;;  %v2057_v3 = vld [vmem:[#allocation5 + $0xa4] sm:$0xf0]  ;;  %v1654_v7 = vor.u32 %v2089_v1, %v1653_v0  ;;  %v2039_v8 = vld [vmem:[#allocation5 + $0x14] sm:$0xf0] }
  0x28   :  { %790 = vmatpush.bf16.msra.mxu3 %v1670_v46  ;;  %v1581_v9 = vld [vmem:[#allocation5 + $0x110] sm:$0xf]  ;;  %v2071_v10 = vld [vmem:[#allocation5 + $0x114] sm:$0xf0]  ;;  %v1526_v11 = vor.u32 %v2057_v3, %v1525_v2  ;;  %v1445_v16 = vld [vmem:[#allocation5] sm:$0xf]  ;;  %v1454_v18 = vor.u32 %v2039_v8, %v1453_v5 }
  0x29   :  { %762 = vmatpush.bf16.msra.mxu1 %v1542_v50  ;;  %v1645_v12 = vld [vmem:[#allocation5 + $0x190] sm:$0xf]  ;;  %v2087_v13 = vld [vmem:[#allocation5 + $0x194] sm:$0xf0]  ;;  %v2037_v17 = vld [vmem:[#allocation5 + $0x4] sm:$0xf0]  ;;  %v1582_v23 = vor.u32 %v2071_v10, %v1581_v9 }
  0x2a   :  { %749 = vmatpush.bf16.msra.mxu0 %v1470_v56  ;;  %v1517_v14 = vld [vmem:[#allocation5 + $0x90] sm:$0xf]  ;;  %v2055_v15 = vld [vmem:[#allocation5 + $0x94] sm:$0xf0]  ;;  %v1573_v19 = vld [vmem:[#allocation5 + $0x100] sm:$0xf]  ;;  %v1646_v24 = vor.u32 %v2087_v13, %v1645_v12  ;;  %v1446_v35 = vor.u32 %v2037_v17, %v1445_v16 }
  0x2b   :  { %777 = vmatpush.bf16.msra.mxu2 %v1598_v57  ;;  %v2069_v20 = vld [vmem:[#allocation5 + $0x104] sm:$0xf0]  ;;  %v1637_v21 = vld [vmem:[#allocation5 + $0x180] sm:$0xf]  ;;  %v1757_v25 = vld [vmem:[#allocation5 + $0x270] sm:$0xf]  ;;  %v1518_v28 = vor.u32 %v2055_v15, %v1517_v14 }
  0x2c   :  { %791 = vmatpush.bf16.msra.mxu3 %v1662_v58  ;;  %v2085_v22 = vld [vmem:[#allocation5 + $0x184] sm:$0xf0]  ;;  %v2115_v26 = vld [vmem:[#allocation5 + $0x274] sm:$0xf0]  ;;  %v2050_v27 = vld [vmem:[#allocation5 + $0x74] sm:$0xf]  ;;  %v1574_v39 = vor.u32 %v2069_v20, %v1573_v19 }
  0x2d   :  { %763 = vmatpush.bf16.msra.mxu1 %v1534_v62  ;;  %v1503_v29 = vld [vmem:[#allocation5 + $0x78] sm:$0xf0]  ;;  %v1509_v30 = vld [vmem:[#allocation5 + $0x80] sm:$0xf]  ;;  %v2053_v31 = vld [vmem:[#allocation5 + $0x84] sm:$0xf0]  ;;  %v1638_v40 = vor.u32 %v2085_v22, %v1637_v21  ;;  %v1758_v44 = vor.u32 %v2115_v26, %v1757_v25 }
  0x2e   :  { %750 = vmatpush.bf16.msra.mxu0 %v1462_v4  ;;  %v1425_v32 = vld [vmem:[#allocation2 + $0x8] sm:$0xf]  ;;  %v2033_v33 = vld [vmem:[#allocation2 + $0x20] sm:$0xf0]  ;;  %v2131_v36 = vld [vmem:[#allocation5 + $0x2f4] sm:$0xf0]  ;;  %v1506_v45 = vor.u32 %v2050_v27, %v1503_v29  ;;  %v1510_v49 = vor.u32 %v2053_v31, %v1509_v30 }
  0x2f   :  { %778 = vmatpush.bf16.msra.mxu2 %v1590_v6  ;;  %v1821_v34 = vld [vmem:[#allocation5 + $0x2f0] sm:$0xf]  ;;  %v1829_v37 = vld [vmem:[#allocation5 + $0x300] sm:$0xf]  ;;  %v2133_v38 = vld [vmem:[#allocation5 + $0x304] sm:$0xf0]  ;;  %v2428_v54 = vor.u32 %v2033_v33, %v1425_v32 }
  0x30   :  { %792 = vmatpush.bf16.msra.mxu3 %v1654_v7  ;;  %v2066_v41 = vld [vmem:[#allocation5 + $0xf4] sm:$0xf]  ;;  %v1567_v42 = vld [vmem:[#allocation5 + $0xf8] sm:$0xf0]  ;;  %v1417_v43 = vld [vmem:[#allocation2] sm:$0xf]  ;;  %v1830_v50 = vor.u32 %v2133_v38, %v1829_v37  ;;  %v1822_v55 = vor.u32 %v2131_v36, %v1821_v34 }
  0x31   :  { %764 = vmatpush.bf16.msra.mxu1 %v1526_v11  ;;  %v2032_v46 = vld [vmem:[#allocation2 + $0x18] sm:$0xf0]  ;;  %v2030_v47 = vld [vmem:[#allocation2 + $0xc] sm:$0xf]  ;;  %v1427_v48 = vld [vmem:[#allocation2 + $0x24] sm:$0xf0]  ;;  %v1570_v59 = vor.u32 %v2066_v41, %v1567_v42 }
  0x32   :  { %751 = vmatpush.bf16.msra.mxu0 %v1454_v18  ;;  %v1749_v51 = vld [vmem:[#allocation5 + $0x260] sm:$0xf]  ;;  %v2113_v52 = vld [vmem:[#allocation5 + $0x264] sm:$0xf0]  ;;  %v2048_v53 = vld [vmem:[#allocation5 + $0x64] sm:$0xf]  ;;  %v2430_v60 = vor.u32 %v2032_v46, %v1417_v43  ;;  %v2432_v63 = vor.u32 %v2030_v47, %v1427_v48 }
  0x33   :  { %779 = vmatpush.bf16.msra.mxu2 %v1582_v23  ;;  %v1495_v56 = vld [vmem:[#allocation5 + $0x68] sm:$0xf0]  ;;  %v1419_v58 = vld [vmem:[#allocation2 + $0x1c] sm:$0xf0]  ;;  %v1813_v61 = vld [vmem:[#allocation5 + $0x2e0] sm:$0xf]  ;;  %v1750_v0 = vor.u32 %v2113_v52, %v1749_v51 }
  0x34   :  { %793 = vmatpush.bf16.msra.mxu3 %v1646_v24  ;;  %v2029_v57 = vld [vmem:[#allocation2 + $0x4] sm:$0xf]  ;;  %v2129_v62 = vld [vmem:[#allocation5 + $0x2e4] sm:$0xf0]  ;;  %v2064_v1 = vld [vmem:[#allocation5 + $0xe4] sm:$0xf]  ;;  %v1498_v3 = vor.u32 %v2048_v53, %v1495_v56 }
  0x35   :  { %765 = vmatpush.bf16.msra.mxu1 %v1518_v28  ;;  %v1559_v2 = vld [vmem:[#allocation5 + $0xe8] sm:$0xf0]  ;;  %v2434_v4 = vor.u32 %v2029_v57, %v1419_v58  ;;  %v1741_v5 = vld [vmem:[#allocation5 + $0x250] sm:$0xf]  ;;  %v2111_v6 = vld [vmem:[#allocation5 + $0x254] sm:$0xf0]  ;;  %v1814_v7 = vor.u32 %v2129_v62, %v1813_v61 }
  0x36   :  { %752 = vmatpush.bf16.msra.mxu0 %v1446_v35  ;;  %v2046_v8 = vld [vmem:[#allocation5 + $0x54] sm:$0xf]  ;;  %v1487_v9 = vld [vmem:[#allocation5 + $0x58] sm:$0xf0]  ;;  %v1562_v10 = vor.u32 %v2064_v1, %v1559_v2  ;;  %v1805_v11 = vld [vmem:[#allocation5 + $0x2d0] sm:$0xf]  ;;  %v1742_v13 = vor.u32 %v2111_v6, %v1741_v5 }
  0x37   :  { %780 = vmatpush.bf16.msra.mxu2 %v1574_v39  ;;  %v2127_v12 = vld [vmem:[#allocation5 + $0x2d4] sm:$0xf0]  ;;  %v2062_v14 = vld [vmem:[#allocation5 + $0xd4] sm:$0xf]  ;;  %v1551_v15 = vld [vmem:[#allocation5 + $0xd8] sm:$0xf0]  ;;  %v1490_v16 = vor.u32 %v2046_v8, %v1487_v9 }
  0x38   :  { %794 = vmatpush.bf16.msra.mxu3 %v1638_v40  ;;  %v1733_v17 = vld [vmem:[#allocation5 + $0x240] sm:$0xf]  ;;  %v2109_v18 = vld [vmem:[#allocation5 + $0x244] sm:$0xf0]  ;;  %v1806_v19 = vor.u32 %v2127_v12, %v1805_v11  ;;  %v2044_v20 = vld [vmem:[#allocation5 + $0x44] sm:$0xf]  ;;  %v1554_v22 = vor.u32 %v2062_v14, %v1551_v15 }
  0x39   :  { %766 = vmatpush.bf16.msra.mxu1 %v1510_v49  ;;  %753 = vmatmul.bf16.vlgmr.msra.gmra.mxu0 %v2430_v60  ;;  %v1479_v21 = vld [vmem:[#allocation5 + $0x48] sm:$0xf0]  ;;  %v1797_v23 = vld [vmem:[#allocation5 + $0x2c0] sm:$0xf]  ;;  %v2125_v24 = vld [vmem:[#allocation5 + $0x2c4] sm:$0xf0]  ;;  %v1734_v25 = vor.u32 %v2109_v18, %v1733_v17 }
  0x3a   :  { %801 = vmatpush.bf16.msrb.mxu0 %v1758_v44  ;;  %781 = vmatmul.bf16.vlgmr.msra.gmra.mxu2 %v2428_v54  ;;  %v2060_v26 = vld [vmem:[#allocation5 + $0xc4] sm:$0xf]  ;;  %v1543_v27 = vld [vmem:[#allocation5 + $0xc8] sm:$0xf0]  ;;  %v1482_v28 = vor.u32 %v2044_v20, %v1479_v21  ;;  %v1725_v29 = vld [vmem:[#allocation5 + $0x230] sm:$0xf]  ;;  %v1798_v31 = vor.u32 %v2125_v24, %v1797_v23 }
  0x3b   :  { %836 = vmatpush.bf16.msrb.mxu2 %v1830_v50  ;;  %795 = vmatmul.bf16.vlgmr.msra.gmra.mxu3 %v2432_v63  ;;  %v2107_v30 = vld [vmem:[#allocation5 + $0x234] sm:$0xf0]  ;;  %v2042_v32 = vld [vmem:[#allocation5 + $0x34] sm:$0xf]  ;;  %v1471_v33 = vld [vmem:[#allocation5 + $0x38] sm:$0xf0]  ;;  %v1546_v35 = vor.u32 %v2060_v26, %v1543_v27 }
  0x3c   :  { %843 = vmatpush.bf16.msrb.mxu3 %v1506_v45  ;;  %767 = vmatmul.bf16.vlgmr.msra.gmra.mxu1 %v2434_v4  ;;  %v1789_v34 = vld [vmem:[#allocation5 + $0x2b0] sm:$0xf]  ;;  %v2123_v36 = vld [vmem:[#allocation5 + $0x2b4] sm:$0xf0]  ;;  %v1441_v37 = vld [vmem:[#allocation2 + $0x18] sm:$0xf]  ;;  %v1726_v39 = vor.u32 %v2107_v30, %v1725_v29  ;;  %v1474_v42 = vor.u32 %v2042_v32, %v1471_v33 }
  0x3d   :  { %815 = vmatpush.bf16.msrb.mxu1 %v1822_v55  ;;  %v2035_v38 = vld [vmem:[#allocation2 + $0x30] sm:$0xf0]  ;;  %v2058_v40 = vld [vmem:[#allocation5 + $0xb4] sm:$0xf]  ;;  %v1717_v43 = vld [vmem:[#allocation5 + $0x220] sm:$0xf]  ;;  %v1790_v45 = vor.u32 %v2123_v36, %v1789_v34 }
  0x3e   :  { %802 = vmatpush.bf16.msrb.mxu0 %v1750_v0  ;;  %v1535_v41 = vld [vmem:[#allocation5 + $0xb8] sm:$0xf0]  ;;  %v2105_v44 = vld [vmem:[#allocation5 + $0x224] sm:$0xf0]  ;;  %v2040_v46 = vld [vmem:[#allocation5 + $0x24] sm:$0xf]  ;;  %v2440_v48 = vor.u32 %v2035_v38, %v1441_v37 }
  0x3f   :  { %857 = vmatpush.bf16.msra.mxu2 %v1570_v59  ;;  %v1463_v47 = vld [vmem:[#allocation5 + $0x28] sm:$0xf0]  ;;  %v1538_v49 = vor.u32 %v2058_v40, %v1535_v41  ;;  %v1781_v50 = vld [vmem:[#allocation5 + $0x2a0] sm:$0xf]  ;;  %v2121_v51 = vld [vmem:[#allocation5 + $0x2a4] sm:$0xf0]  ;;  %v1718_v52 = vor.u32 %v2105_v44, %v1717_v43 }
  0x40   :  { %844 = vmatpush.bf16.msrb.mxu3 %v1498_v3  ;;  %vm741_vm0 = vcmask 130048   ;;  %v2056_v53 = vld [vmem:[#allocation5 + $0xa4] sm:$0xf]  ;;  %v1527_v55 = vld [vmem:[#allocation5 + $0xa8] sm:$0xf0]  ;;  %v1466_v56 = vor.u32 %v2040_v46, %v1463_v47  ;;  %v1782_v61 = vor.u32 %v2121_v51, %v1781_v50  ;;  %s1400_s12 = sshll.u32 %s2481_s7, 4  ;;  %s1401_s12 = int_to_ptr.hbm [resolvable:$true] %s1400_s12 }
  0x41   :  { %816 = vmatpush.bf16.msrb.mxu1 %v1814_v7  ;;  %v1709_v57 = vld [vmem:[#allocation5 + $0x210] sm:$0xf]  ;;  %v2103_v58 = vld [vmem:[#allocation5 + $0x214] sm:$0xf0]  ;;  %v2038_v59 = vld [vmem:[#allocation5 + $0x14] sm:$0xf]  ;;  %v1530_v2 = vor.u32 %v2056_v53, %v1527_v55 }
  0x42   :  { %803 = vmatpush.bf16.msrb.mxu0 %v1742_v13  ;;  %v1455_v62 = vld [vmem:[#allocation5 + $0x18] sm:$0xf0]  ;;  %v1773_v0 = vld [vmem:[#allocation5 + $0x290] sm:$0xf]  ;;  %v2119_v1 = vld [vmem:[#allocation5 + $0x294] sm:$0xf0]  ;;  %v1710_v7 = vor.u32 %v2103_v58, %v1709_v57 }
  0x43   :  { %858 = vmatpush.bf16.msra.mxu2 %v1562_v10  ;;  %v2054_v3 = vld [vmem:[#allocation5 + $0x94] sm:$0xf]  ;;  %v1519_v5 = vld [vmem:[#allocation5 + $0x98] sm:$0xf0]  ;;  %v1701_v6 = vld [vmem:[#allocation5 + $0x200] sm:$0xf]  ;;  %v1458_v11 = vor.u32 %v2038_v59, %v1455_v62  ;;  %v1774_v15 = vor.u32 %v2119_v1, %v1773_v0 }
  0x44   :  { %845 = vmatpush.bf16.msrb.mxu3 %v1490_v16  ;;  %v2101_v8 = vld [vmem:[#allocation5 + $0x204] sm:$0xf0]  ;;  %v2036_v9 = vld [vmem:[#allocation5 + $0x4] sm:$0xf]  ;;  %v1447_v10 = vld [vmem:[#allocation5 + $0x8] sm:$0xf0] }
  0x45   :  { %817 = vmatpush.bf16.msrb.mxu1 %v1806_v19  ;;  %v2082_v12 = vld [vmem:[#allocation5 + $0x174] sm:$0xf]  ;;  %v1631_v13 = vld [vmem:[#allocation5 + $0x178] sm:$0xf0]  ;;  %v1765_v17 = vld [vmem:[#allocation5 + $0x280] sm:$0xf]  ;;  %v1522_v19 = vor.u32 %v2054_v3, %v1519_v5  ;;  %v1702_v23 = vor.u32 %v2101_v8, %v1701_v6  ;;  %v1450_v27 = vor.u32 %v2036_v9, %v1447_v10 }
  0x46   :  { %804 = vmatpush.bf16.msrb.mxu0 %v1734_v25  ;;  %v2114_v14 = vld [vmem:[#allocation5 + $0x274] sm:$0xf]  ;;  %v1759_v16 = vld [vmem:[#allocation5 + $0x278] sm:$0xf0]  ;;  %v2117_v18 = vld [vmem:[#allocation5 + $0x284] sm:$0xf0] }
  0x47   :  { %859 = vmatpush.bf16.msra.mxu2 %v1554_v22  ;;  %v1433_v20 = vld [vmem:[#allocation2 + $0x10] sm:$0xf]  ;;  %v2034_v21 = vld [vmem:[#allocation2 + $0x28] sm:$0xf0]  ;;  %v2052_v22 = vld [vmem:[#allocation5 + $0x84] sm:$0xf]  ;;  %v1762_v32 = vor.u32 %v2114_v14, %v1759_v16  ;;  %v1766_v33 = vor.u32 %v2117_v18, %v1765_v17 }
  0x48   :  { %846 = vmatpush.bf16.msrb.mxu3 %v1482_v28  ;;  %v1511_v24 = vld [vmem:[#allocation5 + $0x88] sm:$0xf0]  ;;  %v2098_v25 = vld [vmem:[#allocation5 + $0x1f4] sm:$0xf]  ;;  %v1695_v26 = vld [vmem:[#allocation5 + $0x1f8] sm:$0xf0]  ;;  %v1634_v28 = vor.u32 %v2082_v12, %v1631_v13  ;;  %v2444_v37 = vor.u32 %v2034_v21, %v1433_v20 }
  0x49   :  { %818 = vmatpush.bf16.msrb.mxu1 %v1798_v31  ;;  %v2130_v29 = vld [vmem:[#allocation5 + $0x2f4] sm:$0xf]  ;;  %v1823_v30 = vld [vmem:[#allocation5 + $0x2f8] sm:$0xf0]  ;;  %v1435_v34 = vld [vmem:[#allocation2 + $0x2c] sm:$0xf0]  ;;  %v1514_v38 = vor.u32 %v2052_v22, %v1511_v24  ;;  %v1698_v41 = vor.u32 %v2098_v25, %v1695_v26 }
  0x4a   :  { %805 = vmatpush.bf16.msrb.mxu0 %v1726_v39  ;;  %1835 = vmatmul.msk.bf16.vlgmr.msrb.gmra.mxu2 %vm741_vm0, %v2440_v48  ;;  %v2031_v31 = vld [vmem:[#allocation2 + $0x14] sm:$0xf]  ;;  %v1623_v36 = vld [vmem:[#allocation5 + $0x168] sm:$0xf0]  ;;  %v2112_v39 = vld [vmem:[#allocation5 + $0x264] sm:$0xf] }
  0x4b   :  { %860 = vmatpush.bf16.msra.mxu2 %v1546_v35  ;;  %v2080_v35 = vld [vmem:[#allocation5 + $0x164] sm:$0xf]  ;;  %v1751_v40 = vld [vmem:[#allocation5 + $0x268] sm:$0xf0]  ;;  %v2446_v44 = vor.u32 %v2031_v31, %v1435_v34  ;;  %v2078_v51 = vld [vmem:[#allocation5 + $0x154] sm:$0xf] }
  0x4c   :  { %847 = vmatpush.bf16.msrb.mxu3 %v1474_v42  ;;  %v1826_v42 = vor.u32 %v2130_v29, %v1823_v30  ;;  %v2096_v43 = vld [vmem:[#allocation5 + $0x1e4] sm:$0xf]  ;;  %v1687_v46 = vld [vmem:[#allocation5 + $0x1e8] sm:$0xf0]  ;;  %v1754_v50 = vor.u32 %v2112_v39, %v1751_v40  ;;  %v2110_v53 = vld [vmem:[#allocation5 + $0x254] sm:$0xf] }
  0x4d   :  { %819 = vmatpush.bf16.msrb.mxu1 %v1790_v45  ;;  %v1626_v45 = vor.u32 %v2080_v35, %v1623_v36  ;;  %v2128_v47 = vld [vmem:[#allocation5 + $0x2e4] sm:$0xf]  ;;  %v1743_v55 = vld [vmem:[#allocation5 + $0x258] sm:$0xf0]  ;;  %v2094_v58 = vld [vmem:[#allocation5 + $0x1d4] sm:$0xf] }
  0x4e   :  { %806 = vmatpush.bf16.msrb.mxu0 %v1718_v52  ;;  %v1615_v52 = vld [vmem:[#allocation5 + $0x158] sm:$0xf0]  ;;  %v2126_v62 = vld [vmem:[#allocation5 + $0x2d4] sm:$0xf]  ;;  %v1746_v1 = vor.u32 %v2110_v53, %v1743_v55  ;;  %v1607_v3 = vld [vmem:[#allocation5 + $0x148] sm:$0xf0] }
  0x4f   :  { %861 = vmatpush.bf16.msra.mxu2 %v1538_v49  ;;  %v1815_v49 = vld [vmem:[#allocation5 + $0x2e8] sm:$0xf0]  ;;  %v1618_v59 = vor.u32 %v2078_v51, %v1615_v52  ;;  %v1807_v0 = vld [vmem:[#allocation5 + $0x2d8] sm:$0xf0]  ;;  %v2108_v5 = vld [vmem:[#allocation5 + $0x244] sm:$0xf] }
  0x50   :  { %848 = vmatpush.bf16.msrb.mxu3 %v1466_v56  ;;  %v1690_v56 = vor.u32 %v2096_v43, %v1687_v46  ;;  %v1818_v57 = vor.u32 %v2128_v47, %v1815_v49  ;;  %v1735_v6 = vld [vmem:[#allocation5 + $0x248] sm:$0xf0]  ;;  %v1810_v8 = vor.u32 %v2126_v62, %v1807_v0  ;;  %v2092_v9 = vld [vmem:[#allocation5 + $0x1c4] sm:$0xf]  ;;  %v1599_v16 = vld [vmem:[#allocation5 + $0x138] sm:$0xf0] }
  0x51   :  { %820 = vmatpush.bf16.msrb.mxu1 %v1782_v61  ;;  %v1679_v61 = vld [vmem:[#allocation5 + $0x1d8] sm:$0xf0]  ;;  %v1671_v10 = vld [vmem:[#allocation5 + $0x1c8] sm:$0xf0]  ;;  %v2124_v12 = vld [vmem:[#allocation5 + $0x2c4] sm:$0xf]  ;;  %v1738_v14 = vor.u32 %v2108_v5, %v1735_v6 }
  0x52   :  { %807 = vmatpush.bf16.msrb.mxu0 %v1710_v7  ;;  %v1682_v7 = vor.u32 %v2094_v58, %v1679_v61  ;;  %v1799_v13 = vld [vmem:[#allocation5 + $0x2c8] sm:$0xf0]  ;;  %v2106_v17 = vld [vmem:[#allocation5 + $0x234] sm:$0xf]  ;;  %v1674_v18 = vor.u32 %v2092_v9, %v1671_v10  ;;  %v1663_v21 = vld [vmem:[#allocation5 + $0x1b8] sm:$0xf0] }
  0x53   :  { %862 = vmatpush.bf16.msra.mxu2 %v1530_v2  ;;  %v2076_v2 = vld [vmem:[#allocation5 + $0x144] sm:$0xf]  ;;  %v2122_v22 = vld [vmem:[#allocation5 + $0x2b4] sm:$0xf]  ;;  %v1591_v26 = vld [vmem:[#allocation5 + $0x128] sm:$0xf0] }
  0x54   :  { %849 = vmatpush.bf16.msrb.mxu3 %v1458_v11  ;;  %v1610_v11 = vor.u32 %v2076_v2, %v1607_v3  ;;  %v2072_v25 = vld [vmem:[#allocation5 + $0x124] sm:$0xf]  ;;  %v1783_v35 = vld [vmem:[#allocation5 + $0x2a8] sm:$0xf0]  ;;  %v1583_v39 = vld [vmem:[#allocation5 + $0x118] sm:$0xf0] }
  0x55   :  { %821 = vmatpush.bf16.msrb.mxu1 %v1774_v15  ;;  %v2074_v15 = vld [vmem:[#allocation5 + $0x134] sm:$0xf]  ;;  %v2088_v31 = vld [vmem:[#allocation5 + $0x1a4] sm:$0xf]  ;;  %v1647_v47 = vld [vmem:[#allocation5 + $0x198] sm:$0xf0] }
  0x56   :  { %808 = vmatpush.bf16.msrb.mxu0 %v1702_v23  ;;  %v1602_v20 = vor.u32 %v2074_v15, %v1599_v16  ;;  %v1791_v23 = vld [vmem:[#allocation5 + $0x2b8] sm:$0xf0]  ;;  %v2120_v34 = vld [vmem:[#allocation5 + $0x2a4] sm:$0xf]  ;;  %v2102_v40 = vld [vmem:[#allocation5 + $0x214] sm:$0xf] }
  0x57   :  { %863 = vmatpush.bf16.msra.mxu2 %v1522_v19  ;;  %v2090_v19 = vld [vmem:[#allocation5 + $0x1b4] sm:$0xf]  ;;  %v1794_v30 = vor.u32 %v2122_v22, %v1791_v23  ;;  %v1786_v43 = vor.u32 %v2120_v34, %v1783_v35  ;;  %v2068_v52 = vld [vmem:[#allocation5 + $0x104] sm:$0xf]  ;;  %v1575_v53 = vld [vmem:[#allocation5 + $0x108] sm:$0xf0] }
  0x58   :  { %850 = vmatpush.bf16.msrb.mxu3 %v1450_v27  ;;  %v2104_v27 = vld [vmem:[#allocation5 + $0x224] sm:$0xf]  ;;  %v1666_v29 = vor.u32 %v2090_v19, %v1663_v21  ;;  %v2118_v49 = vld [vmem:[#allocation5 + $0x294] sm:$0xf]  ;;  %v1831_v58 = vld [vmem:[#allocation5 + $0x308] sm:$0xf0]  ;;  %v1578_v62 = vor.u32 %v2068_v52, %v1575_v53 }
  0x59   :  { %822 = vmatpush.bf16.msrb.mxu1 %v1766_v33  ;;  %809 = vmatmul.bf16.vlgmr.msrb.gmra.mxu0 %v2444_v37  ;;  %v1655_v33 = vld [vmem:[#allocation5 + $0x1a8] sm:$0xf0]  ;;  %v2100_v55 = vld [vmem:[#allocation5 + $0x204] sm:$0xf]  ;;  %v1887_v15 = vld [vmem:[#allocation8 + $0x60] sm:$0xf] }
  0x5a   :  { %871 = vmatpush.bf16.msra.mxu0 %v1634_v28  ;;  %v1719_v28 = vld [vmem:[#allocation5 + $0x228] sm:$0xf0]  ;;  %v2084_v0 = vld [vmem:[#allocation5 + $0x184] sm:$0xf]  ;;  %v2147_v16 = vld [vmem:[#allocation8 + $0x64] sm:$0xf0] }
  0x5b   :  { %864 = vmatpush.bf16.msra.mxu2 %v1514_v38  ;;  %851 = vmatmul.bf16.vlgmr.msrb.gmra.mxu3 %v2430_v60  ;;  %v1802_v60 = vor.u32 %v2124_v12, %v1799_v13  ;;  %v1722_v36 = vor.u32 %v2104_v27, %v1719_v28  ;;  %v2070_v38 = vld [vmem:[#allocation5 + $0x114] sm:$0xf]  ;;  %v2116_v3 = vld [vmem:[#allocation5 + $0x284] sm:$0xf]  ;;  %v1767_v5 = vld [vmem:[#allocation5 + $0x288] sm:$0xf0] }
  0x5c   :  { %899 = vmatpush.bf16.msra.mxu3 %v1762_v32  ;;  %823 = vmatmul.bf16.vlgmr.msrb.gmra.mxu1 %v2446_v44  ;;  %v1594_v32 = vor.u32 %v2072_v25, %v1591_v26  ;;  %v1586_v46 = vor.u32 %v2070_v38, %v1583_v39  ;;  %v1895_v9 = vld [vmem:[#allocation8 + $0x70] sm:$0xf]  ;;  %v2149_v10 = vld [vmem:[#allocation8 + $0x74] sm:$0xf0]  ;;  %v1897_v13 = vld [vmem:[#allocation8 + $0x78] sm:$0xf0] }
  0x5d   :  { %885 = vmatpush.bf16.msra.mxu1 %v1698_v41  ;;  %v1711_v41 = vld [vmem:[#allocation5 + $0x218] sm:$0xf0]  ;;  %v1896_v12 = vor.u32 %v2149_v10, %v1895_v9  ;;  %v2142_v22 = vld [vmem:[#allocation8 + $0x44] sm:$0xf]  ;;  %v1863_v26 = vld [vmem:[#allocation8 + $0x30] sm:$0xf] }
  0x5e   :  { %872 = vmatpush.bf16.msra.mxu0 %v1626_v45  ;;  %865 = vmatmul.bf16.vlgmr.msra.gmra.mxu2 %v2434_v4  ;;  %v1727_v4 = vld [vmem:[#allocation5 + $0x238] sm:$0xf0]  ;;  %v2086_v45 = vld [vmem:[#allocation5 + $0x194] sm:$0xf]  ;;  %v1714_v51 = vor.u32 %v2102_v40, %v1711_v41  ;;  %v2141_v27 = vld [vmem:[#allocation8 + $0x34] sm:$0xf0] }
  0x5f   :  { %913 = vmatpush.bf16.msrb.mxu2 %v1826_v42  ;;  %v1730_v24 = vor.u32 %v2106_v17, %v1727_v4  ;;  %v1658_v42 = vor.u32 %v2088_v31, %v1655_v33  ;;  %v2146_v17 = vld [vmem:[#allocation8 + $0x64] sm:$0xf]  ;;  %v2143_v21 = vld [vmem:[#allocation8 + $0x44] sm:$0xf0]  ;;  %v2140_v28 = vld [vmem:[#allocation8 + $0x34] sm:$0xf] }
  0x60   :  { %900 = vmatpush.bf16.msra.mxu3 %v1754_v50  ;;  %v1775_v50 = vld [vmem:[#allocation5 + $0x298] sm:$0xf0]  ;;  %v2138_v34 = vld [vmem:[#allocation8 + $0x24] sm:$0xf]  ;;  %v1847_v39 = vld [vmem:[#allocation8 + $0x10] sm:$0xf] }
  0x61   :  { %886 = vmatpush.bf16.msra.mxu1 %v1690_v56  ;;  %v1703_v56 = vld [vmem:[#allocation5 + $0x208] sm:$0xf0]  ;;  %v1778_v61 = vor.u32 %v2118_v49, %v1775_v50  ;;  %v2139_v33 = vld [vmem:[#allocation8 + $0x24] sm:$0xf0]  ;;  %v2136_v41 = vld [vmem:[#allocation8 + $0x14] sm:$0xf] }
  0x62   :  { %873 = vmatpush.bf16.msra.mxu0 %v1618_v59  ;;  %v1650_v59 = vor.u32 %v2086_v45, %v1647_v47  ;;  %v1706_v2 = vor.u32 %v2100_v55, %v1703_v56  ;;  %v2137_v40 = vld [vmem:[#allocation8 + $0x14] sm:$0xf0]  ;;  %v1839_v50 = vld [vmem:[#allocation8] sm:$0xf]  ;;  %v2134_v52 = vld [vmem:[#allocation8 + $0x4] sm:$0xf] }
  0x63   :  { %914 = vmatpush.bf16.msrb.mxu2 %v1818_v57  ;;  %v2132_v57 = vld [vmem:[#allocation5 + $0x304] sm:$0xf]  ;;  %v1841_v55 = vld [vmem:[#allocation8 + $0x8] sm:$0xf0]  ;;  %v1961_v9 = vld [vmem:[#allocation8 + $0xf8] sm:$0xf0] }
  0x64   :  { %901 = vmatpush.bf16.msra.mxu3 %v1746_v1  ;;  %v1639_v1 = vld [vmem:[#allocation5 + $0x188] sm:$0xf0]  ;;  %v1834_v6 = vor.u32 %v2132_v57, %v1831_v58  ;;  %v1844_v57 = vor.u32 %v2134_v52, %v1841_v55  ;;  %v1919_v52 = vld [vmem:[#allocation8 + $0xa0] sm:$0xf] }
  0x65   :  { %887 = vmatpush.bf16.msra.mxu1 %v1682_v7  ;;  %v1642_v7 = vor.u32 %v2084_v0, %v1639_v1 }
  0x66   :  { %874 = vmatpush.bf16.msra.mxu0 %v1610_v11  ;;  %v2148_v11 = vld [vmem:[#allocation8 + $0x74] sm:$0xf] }
  0x67   :  { %915 = vmatpush.bf16.msrb.mxu2 %v1810_v8  ;;  %v1770_v8 = vor.u32 %v2116_v3, %v1767_v5  ;;  %v1959_v5 = vld [vmem:[#allocation8 + $0xf0] sm:$0xf] }
  0x68   :  { %902 = vmatpush.bf16.msra.mxu3 %v1738_v14  ;;  %v1900_v14 = vor.u32 %v2148_v11, %v1897_v13  ;;  %v1951_v13 = vld [vmem:[#allocation8 + $0xe0] sm:$0xf] }
  0x69   :  { %888 = vmatpush.bf16.msra.mxu1 %v1674_v18  ;;  %v2145_v18 = vld [vmem:[#allocation8 + $0x54] sm:$0xf0] }
  0x6a   :  { %875 = vmatpush.bf16.msra.mxu0 %v1602_v20  ;;  %v1871_v20 = vld [vmem:[#allocation8 + $0x40] sm:$0xf] }
  0x6b   :  { %916 = vmatpush.bf16.msrb.mxu2 %v1802_v60  ;;  %v1881_v60 = vld [vmem:[#allocation8 + $0x58] sm:$0xf0]  ;;  %v1872_v23 = vor.u32 %v2143_v21, %v1871_v20  ;;  %v2160_v20 = vld [vmem:[#allocation8 + $0xd4] sm:$0xf] }
  0x6c   :  { %903 = vmatpush.bf16.msra.mxu3 %v1730_v24  ;;  %v1873_v24 = vld [vmem:[#allocation8 + $0x48] sm:$0xf0] }
  0x6d   :  { %889 = vmatpush.bf16.msra.mxu1 %v1666_v29  ;;  %v1876_v25 = vor.u32 %v2142_v22, %v1873_v24  ;;  %v1864_v29 = vor.u32 %v2141_v27, %v1863_v26  ;;  %v1935_v27 = vld [vmem:[#allocation8 + $0xc0] sm:$0xf] }
  0x6e   :  { %876 = vmatpush.bf16.msra.mxu0 %v1594_v32  ;;  %v1855_v32 = vld [vmem:[#allocation8 + $0x20] sm:$0xf] }
  0x6f   :  { %917 = vmatpush.bf16.msrb.mxu2 %v1794_v30  ;;  %v1865_v30 = vld [vmem:[#allocation8 + $0x38] sm:$0xf0]  ;;  %v1856_v35 = vor.u32 %v2139_v33, %v1855_v32  ;;  %v1937_v32 = vld [vmem:[#allocation8 + $0xc8] sm:$0xf0] }
  0x70   :  { %904 = vmatpush.bf16.msra.mxu3 %v1722_v36  ;;  %v1868_v31 = vor.u32 %v2140_v28, %v1865_v30  ;;  %v1857_v36 = vld [vmem:[#allocation8 + $0x28] sm:$0xf0]  ;;  %v2159_v28 = vld [vmem:[#allocation8 + $0xc4] sm:$0xf0] }
  0x71   :  { %890 = vmatpush.bf16.msra.mxu1 %v1658_v42  ;;  %v1860_v38 = vor.u32 %v2138_v34, %v1857_v36  ;;  %v1848_v42 = vor.u32 %v2137_v40, %v1847_v39  ;;  %v1936_v30 = vor.u32 %v2159_v28, %v1935_v27  ;;  %v1927_v40 = vld [vmem:[#allocation8 + $0xb0] sm:$0xf] }
  0x72   :  { %877 = vmatpush.bf16.msra.mxu0 %v1586_v46  ;;  %v2458_v46 = vld [vmem:[#allocation7] sm:$0x3] }
  0x73   :  { %918 = vmatpush.bf16.msrb.mxu2 %v1786_v43  ;;  %v1849_v43 = vld [vmem:[#allocation8 + $0x18] sm:$0xf0]  ;;  %v212_v58 = vperm.slane %v2458_v46, 0 }
  0x74   :  { %905 = vmatpush.bf16.msra.mxu3 %v1714_v51  ;;  %v1852_v45 = vor.u32 %v2136_v41, %v1849_v43  ;;  %v2135_v51 = vld [vmem:[#allocation8 + $0x4] sm:$0xf0]  ;;  %v2157_v41 = vld [vmem:[#allocation8 + $0xb4] sm:$0xf0] }
  0x75   :  { %891 = vmatpush.bf16.msra.mxu1 %v1650_v59  ;;  %v1840_v53 = vor.u32 %v2135_v51, %v1839_v50  ;;  %v1928_v43 = vor.u32 %v2157_v41, %v1927_v40  ;;  %v2171_v40 = vld [vmem:[#allocation10 + $0x28] sm:$0xff] }
  0x76   :  { %878 = vmatpush.bf16.msra.mxu0 %v1578_v62  ;;  %v2179_v41 = vld [vmem:[#allocation10 + $0x68] sm:$0xff] }
  0x77   :  { %919 = vmatpush.bf16.msrb.mxu2 %v1778_v61 }
  0x78   :  { %906 = vmatpush.bf16.msra.mxu3 %v1706_v2 }
  0x79   :  { %892 = vmatpush.bf16.msra.mxu1 %v1642_v7  ;;  %879 = vmatmul.bf16.vlgmr.msra.gmra.mxu0 %v2428_v54  ;;  %v1888_v54 = vor.u32 %v2147_v16, %v1887_v15  ;;  %v2164_v7 = vld [vmem:[#allocation8 + $0xf4] sm:$0xf]  ;;  %v2162_v15 = vld [vmem:[#allocation8 + $0xe4] sm:$0xf] }
  0x7a   :  { %934 = vmatpush.bf16.msrb.mxu0 %v1834_v6  ;;  %v2165_v6 = vld [vmem:[#allocation8 + $0xf4] sm:$0xf0]  ;;  %v1964_v11 = vor.u32 %v2164_v7, %v1961_v9  ;;  %v1903_v7 = vld [vmem:[#allocation8 + $0x80] sm:$0xf]  ;;  %v2150_v9 = vld [vmem:[#allocation8 + $0x84] sm:$0xf] }
  0x7b   :  { %907 = vmatmul.bf16.vlgmr.msra.gmra.mxu3 %v2444_v37  ;;  %920 = vmatpush.bf16.msrb.mxu2 %v1770_v8  ;;  %v1889_v37 = vld [vmem:[#allocation8 + $0x68] sm:$0xf0]  ;;  %v1960_v8 = vor.u32 %v2165_v6, %v1959_v5 }
  0x7c   :  { %893 = vmatmul.bf16.vlgmr.msra.gmra.mxu1 %v2432_v63  ;;  %v1892_v4 = vor.u32 %v2146_v17, %v1889_v37  ;;  %v1879_v63 = vld [vmem:[#allocation8 + $0x50] sm:$0xf]  ;;  %v1953_v37 = vld [vmem:[#allocation8 + $0xe8] sm:$0xf0] }
  0x7d   :  { %1145 = vmatpush.bf16.msrb.mxu1 %v1896_v12  ;;  %1159 = vmatpush.bf16.msrb.mxu3 %v1960_v8  ;;  %v2151_v8 = vld [vmem:[#allocation8 + $0x84] sm:$0xf0] }
  0x7e   :  { %921 = vmatmul.bf16.vlgmr.msrb.gmra.mxu2 %v2446_v44  ;;  %1173 = vmatpush.bf16.msra.mxu0 %v1900_v14  ;;  %v2144_v44 = vld [vmem:[#allocation8 + $0x54] sm:$0xf]  ;;  %v2163_v14 = vld [vmem:[#allocation8 + $0xe4] sm:$0xf0] }
  0x7f   :  { %v1884_v19 = vor.u32 %v2144_v44, %v1881_v60  ;;  %1187 = vmatpush.bf16.msra.mxu2 %v1964_v11  ;;  %v1905_v11 = vld [vmem:[#allocation8 + $0x88] sm:$0xf0] }
  0x81   :  { %1146 = vmatpush.bf16.msrb.mxu1 %v1888_v54  ;;  %v1952_v54 = vor.u32 %v2163_v14, %v1951_v13  ;;  %v213_v13 = vperm.slane %v2458_v46, 1 }
  0x82   :  { %1174 = vmatpush.bf16.msra.mxu0 %v1892_v4 }
  0x83   :  { %1160 = vmatpush.bf16.msrb.mxu3 %v1952_v54 }
  0x86   :  { %1175 = vmatpush.bf16.msra.mxu0 %v1884_v19  ;;  %v2161_v19 = vld [vmem:[#allocation8 + $0xd4] sm:$0xf0] }
  0x89   :  { %1836 = vmatmul.msk.bf16.vlgmr.msrb.gmra.mxu0 %vm741_vm0, %v2440_v48  ;;  %v1880_v48 = vor.u32 %v2145_v18, %v1879_v63  ;;  %v1956_v63 = vor.u32 %v2162_v15, %v1953_v37 }
  0x8a   :  { %1176 = vmatpush.bf16.msra.mxu0 %v1876_v25 }
  0x8b   :  { %1147 = vmatpush.bf16.msrb.mxu1 %v1880_v48  ;;  %1188 = vmatpush.bf16.msra.mxu2 %v1956_v63  ;;  %v1943_v48 = vld [vmem:[#allocation8 + $0xd0] sm:$0xf] }
  0x8c   :  { %v1944_v22 = vor.u32 %v2161_v19, %v1943_v48 }
  0x8e   :  { %1177 = vmatpush.bf16.msra.mxu0 %v1868_v31  ;;  %1161 = vmatpush.bf16.msrb.mxu3 %v1944_v22  ;;  %v2158_v31 = vld [vmem:[#allocation8 + $0xc4] sm:$0xf] }
  0x8f   :  { %1148 = vmatpush.bf16.msrb.mxu1 %v1872_v23  ;;  %v1945_v23 = vld [vmem:[#allocation8 + $0xd8] sm:$0xf0]  ;;  %v1940_v34 = vor.u32 %v2158_v31, %v1937_v32 }
  0x90   :  { %v1948_v24 = vor.u32 %v2160_v20, %v1945_v23 }
  0x92   :  { %1178 = vmatpush.bf16.msra.mxu0 %v1860_v38  ;;  %1189 = vmatpush.bf16.msra.mxu2 %v1948_v24 }
  0x93   :  { %1149 = vmatpush.bf16.msrb.mxu1 %v1864_v29  ;;  %1162 = vmatpush.bf16.msrb.mxu3 %v1936_v30 }
  0x96   :  { %1179 = vmatpush.bf16.msra.mxu0 %v1852_v45  ;;  %1190 = vmatpush.bf16.msra.mxu2 %v1940_v34  ;;  %v1929_v45 = vld [vmem:[#allocation8 + $0xb8] sm:$0xf0] }
  0x97   :  { %1150 = vmatpush.bf16.msrb.mxu1 %v1856_v35  ;;  %1163 = vmatpush.bf16.msrb.mxu3 %v1928_v43  ;;  %v2178_v43 = vld [vmem:[#allocation10 + $0x60] sm:$0xff] }
  0x9a   :  { %1180 = vmatpush.bf16.msra.mxu0 %v1844_v57  ;;  %v1921_v57 = vld [vmem:[#allocation8 + $0xa8] sm:$0xf0] }
  0x9b   :  { %1151 = vmatpush.bf16.msrb.mxu1 %v1848_v42  ;;  %v2156_v42 = vld [vmem:[#allocation8 + $0xb4] sm:$0xf] }
  0x9f   :  { %1152 = vmatpush.bf16.msrb.mxu1 %v1840_v53  ;;  %v2155_v53 = vld [vmem:[#allocation8 + $0xa4] sm:$0xf0] }
  0xa0   :  { %v1920_v55 = vor.u32 %v2155_v53, %v1919_v52  ;;  %v2175_v52 = vld [vmem:[#allocation10 + $0x48] sm:$0xff]  ;;  %v2166_v53 = vld [vmem:[#allocation10] sm:$0xff] }
  0xa2   :  { %1164 = vmatpush.bf16.msrb.mxu3 %v1920_v55  ;;  %v2174_v55 = vld [vmem:[#allocation10 + $0x40] sm:$0xff] }
  0xb6   :  { %v754_v47 = vpop.f32.mrf.mxu0 }
  0xb7   :  { %v755_v59 = vadd.f32 %v754_v47, %v212_v58 }
  0xb9   :  { %v768_v56 = vpop.f32.mrf.mxu1 }
  0xba   :  { %v769_v0 = vadd.f32 %v768_v56, %v755_v59  ;;  %v2154_v56 = vld [vmem:[#allocation8 + $0xa4] sm:$0xf] }
  0xbb   :  { %v1924_v59 = vor.u32 %v2154_v56, %v1921_v57 }
  0xbd   :  { %v782_v49 = vpop.f32.mrf.mxu2 }
  0xbe   :  { %v756_v61 = vpop.f32.mrf.mxu0  ;;  %v796_v1 = vpop.f32.mrf.mxu3  ;;  %v783_v10 = vadd.f32 %v782_v49, %v769_v0  ;;  %v1932_v49 = vor.u32 %v2156_v42, %v1929_v45  ;;  %v2153_v0 = vld [vmem:[#allocation8 + $0x94] sm:$0xf0]  ;;  %v2170_v42 = vld [vmem:[#allocation10 + $0x20] sm:$0xff] }
  0xbf   :  { %v757_v3 = vadd.f32 %v756_v61, %v212_v58  ;;  %v2169_v45 = vld [vmem:[#allocation10 + $0x18] sm:$0xff] }
  0xc0   :  { %v797_v4 = vadd.f32 %v796_v1, %v783_v10  ;;  %1191 = vmatpush.bf16.msra.mxu2 %v1932_v49  ;;  %v2152_v1 = vld [vmem:[#allocation8 + $0x94] sm:$0xf]  ;;  %v1904_v10 = vor.u32 %v2151_v8, %v1903_v7 }
  0xc1   :  { %v770_v2 = vpop.f32.mrf.mxu1  ;;  %v2168_v49 = vld [vmem:[#allocation10 + $0x10] sm:$0xff] }
  0xc2   :  { %v771_v12 = vadd.f32 %v770_v2, %v757_v3  ;;  %v1913_v3 = vld [vmem:[#allocation8 + $0x98] sm:$0xf0] }
  0xc3   :  { %v1916_v6 = vor.u32 %v2152_v1, %v1913_v3 }
  0xc4   :  { %1192 = vmatpush.bf16.msra.mxu2 %v1924_v59 }
  0xc5   :  { %v784_v62 = vpop.f32.mrf.mxu2 }
  0xc6   :  { %v785_v44 = vadd.f32 %v784_v62, %v771_v12  ;;  %v798_v21 = vpop.f32.mrf.mxu3  ;;  %v1911_v62 = vld [vmem:[#allocation8 + $0x90] sm:$0xf]  ;;  %v1908_v12 = vor.u32 %v2150_v9, %v1905_v11 }
  0xc7   :  { %v1912_v2 = vor.u32 %v2153_v0, %v1911_v62 }
  0xc8   :  { %v799_v25 = vadd.f32 %v798_v21, %v785_v44  ;;  %1193 = vmatpush.bf16.msra.mxu2 %v1916_v6 }
  0xc9   :  { %1165 = vmatpush.bf16.msrb.mxu3 %v1912_v2 }
  0xcc   :  { %1194 = vmatpush.bf16.msra.mxu2 %v1908_v12 }
  0xcd   :  { %v838_v17 = vpop.f32.mrf.mxu2  ;;  %1166 = vmatpush.bf16.msrb.mxu3 %v1904_v10 }
  0xd5   :  { %v840_v36 = vpop.f32.mrf.mxu2 }
  0xd6   :  { %v810_v16 = vpop.f32.mrf.mxu0 }
  0xd7   :  { %v811_v60 = vadd.f32 %v810_v16, %v797_v4 }
  0xd9   :  { %v824_v18 = vpop.f32.mrf.mxu1 }
  0xda   :  { %v825_v26 = vadd.f32 %v824_v18, %v811_v60 }
  0xdc   :  { %v839_v38 = vadd.f32 %v838_v17, %v825_v26 }
  0xde   :  { %v812_v29 = vpop.f32.mrf.mxu0  ;;  %v941_v50 = vmax.f32 %v839_v38, 0.0  ;;  %v852_v61 = vpop.f32.mrf.mxu3  ;;  %v2172_v38 = vld [vmem:[#allocation10 + $0x30] sm:$0xff] }
  0xdf   :  { %v813_v33 = vadd.f32 %v812_v29, %v799_v25  ;;  %v853_v17 = vadd.f32 %v852_v61, %v213_v13 }
  0xe1   :  { %v826_v35 = vpop.f32.mrf.mxu1  ;;  %v866_v5 = vpop.f32.mrf.mxu2 }
  0xe2   :  { %v827_v39 = vadd.f32 %v826_v35, %v813_v33  ;;  %v867_v37 = vadd.f32 %v866_v5, %v853_v17  ;;  %v2173_v35 = vld [vmem:[#allocation10 + $0x38] sm:$0xff] }
  0xe3   :  { %1339 = vmatpush.bf16.msra.mxu1 %v2173_v35 }
  0xe4   :  { %v841_v47 = vadd.f32 %v840_v36, %v827_v39  ;;  %v2181_v36 = vld [vmem:[#allocation10 + $0x78] sm:$0xff]  ;;  %v2180_v39 = vld [vmem:[#allocation10 + $0x70] sm:$0xff] }
  0xe5   :  { %1353 = vmatpush.bf16.msra.mxu3 %v2181_v36 }
  0xe6   :  { %v943_v51 = vmax.f32 %v841_v47, 0.0  ;;  %v854_v14 = vpop.f32.mrf.mxu3  ;;  %v2177_v47 = vld [vmem:[#allocation10 + $0x58] sm:$0xff] }
  0xe7   :  { %v855_v4 = vadd.f32 %v854_v14, %v213_v13  ;;  %1340 = vmatpush.bf16.msra.mxu1 %v2172_v38 }
  0xe8   :  { %v945_v58 = vpack.c.bf16 %v943_v51, %v941_v50  ;;  %v2176_v50 = vld [vmem:[#allocation10 + $0x50] sm:$0xff]  ;;  %v2167_v51 = vld [vmem:[#allocation10 + $0x8] sm:$0xff] }
  0xe9   :  { %v868_v16 = vpop.f32.mrf.mxu2  ;;  %1354 = vmatpush.bf16.msra.mxu3 %v2180_v39 }
  0xea   :  { %1153 = vmatmul.bf16.vlgmr.msrb.gmra.mxu1 %v945_v58  ;;  %1181 = vmatmul.bf16.vlgmr.msra.gmra.mxu0 %v945_v58  ;;  %v869_v60 = vadd.f32 %v868_v16, %v855_v4  ;;  %v979_v58 = vld [vmem:[%s2478_s4] sm:$0x3]  ;;  %v1367_v4 = vlaneseq }
  0xeb   :  { %1341 = vmatpush.bf16.msra.mxu1 %v2171_v40  ;;  %v981_v62 = vperm.slane %v979_v58, 0  ;;  %v982_v0 = vperm.slane %v979_v58, 1 }
  0xed   :  { %1355 = vmatpush.bf16.msra.mxu3 %v2179_v41 }
  0xef   :  { %1342 = vmatpush.bf16.msra.mxu1 %v2170_v42 }
  0xf1   :  { %1356 = vmatpush.bf16.msra.mxu3 %v2178_v43 }
  0xf3   :  { %1343 = vmatpush.bf16.msra.mxu1 %v2169_v45 }
  0xf5   :  { %1357 = vmatpush.bf16.msra.mxu3 %v2177_v47 }
  0xf6   :  { %v880_v15 = vpop.f32.mrf.mxu0 }
  0xf7   :  { %v881_v48 = vadd.f32 %v880_v15, %v867_v37  ;;  %1344 = vmatpush.bf16.msra.mxu1 %v2168_v49 }
  0xf9   :  { %v894_v54 = vpop.f32.mrf.mxu1  ;;  %1358 = vmatpush.bf16.msra.mxu3 %v2176_v50 }
  0xfa   :  { %v895_v21 = vadd.f32 %v894_v54, %v881_v48 }
  0xfb   :  { %1345 = vmatpush.bf16.msra.mxu1 %v2167_v51 }
  0xfd   :  { %1359 = vmatpush.bf16.msra.mxu3 %v2175_v52 }
  0xfe   :  { %v908_v63 = vpop.f32.mrf.mxu3  ;;  %v882_v18 = vpop.f32.mrf.mxu0 }
  0xff   :  { %v883_v19 = vadd.f32 %v882_v18, %v869_v60  ;;  %v909_v24 = vadd.f32 %v908_v63, %v895_v21  ;;  %1346 = vmatpush.bf16.msra.mxu1 %v2166_v53  ;;  %v2194_v18 = vld [vmem:[%s2480_s6] ss:$0 sm:$0xff]  ;;  %s2366_s6 = smov [#allocation11]  }
 0x100   :  { %s1398_s30 = sshll.u32 %s2366_s6, 4  ;;  %s1399_s30 = int_to_ptr.vmem [resolvable:$true] %s1398_s30 }
 0x101   :  { %v922_v44 = vpop.f32.mrf.mxu2  ;;  %v896_v20 = vpop.f32.mrf.mxu1  ;;  %1360 = vmatpush.bf16.msra.mxu3 %v2174_v55 }
 0x102   :  { %v897_v46 = vadd.f32 %v896_v20, %v883_v19  ;;  %v923_v27 = vadd.f32 %v922_v44, %v909_v24  ;;  %v1368_v44 = vand.u32 127, %v1367_v4 }
 0x104   :  { %vm1369_vm1 = vcmp.lt.s32.totalorder %v1368_v44, 10 }
 0x106   :  { %v910_v22 = vpop.f32.mrf.mxu3  ;;  %v936_v23 = vpop.f32.mrf.mxu0 }
 0x107   :  { %v911_v25 = vadd.f32 %v910_v22, %v897_v46  ;;  %v937_v28 = vadd.f32 %v936_v23, %v923_v27 }
 0x109   :  { %v924_v26 = vpop.f32.mrf.mxu2  ;;  %v942_v32 = vmax.f32 %v937_v28, 0.0 }
 0x10a   :  { %v925_v29 = vadd.f32 %v924_v26, %v911_v25 }
 0x10e   :  { %v938_v30 = vpop.f32.mrf.mxu0 }
 0x10f   :  { %v939_v31 = vadd.f32 %v938_v30, %v925_v29 }
 0x111   :  { %v944_v33 = vmax.f32 %v939_v31, 0.0 }
 0x113   :  { %v946_v34 = vpack.c.bf16 %v944_v33, %v942_v32 }
 0x115   :  { %1167 = vmatmul.bf16.vlgmr.msrb.gmra.mxu3 %v946_v34  ;;  %1195 = vmatmul.bf16.vlgmr.msra.gmra.mxu2 %v946_v34 }
 0x167   :  { %v1154_v56 = vpop.f32.mrf.mxu1  ;;  %v1182_v57 = vpop.f32.mrf.mxu0 }
 0x168   :  { %v1155_v3 = vadd.f32 %v1154_v56, %v981_v62  ;;  %v1183_v5 = vadd.f32 %v1182_v57, %v982_v0 }
 0x16f   :  { %v1156_v1 = vpop.f32.mrf.mxu1  ;;  %v1184_v2 = vpop.f32.mrf.mxu0 }
 0x170   :  { %v1157_v6 = vadd.f32 %v1156_v1, %v981_v62  ;;  %v1185_v7 = vadd.f32 %v1184_v2, %v982_v0 }
 0x198   :  { %v1168_v59 = vpop.f32.mrf.mxu3  ;;  %v1196_v61 = vpop.f32.mrf.mxu2 }
 0x199   :  { %v1169_v8 = vadd.f32 %v1168_v59, %v1155_v3  ;;  %v1197_v9 = vadd.f32 %v1196_v61, %v1183_v5 }
 0x19b   :  { %v1201_v14 = vmax.f32 %v1169_v8, 0.0  ;;  %v1202_v15 = vmax.f32 %v1197_v9, 0.0 }
 0x1a0   :  { %v1170_v10 = vpop.f32.mrf.mxu3  ;;  %v1198_v11 = vpop.f32.mrf.mxu2 }
 0x1a1   :  { %v1171_v12 = vadd.f32 %v1170_v10, %v1157_v6  ;;  %v1199_v13 = vadd.f32 %v1198_v11, %v1185_v7 }
 0x1a3   :  { %v1203_v16 = vmax.f32 %v1171_v12, 0.0  ;;  %v1204_v17 = vmax.f32 %v1199_v13, 0.0 }
 0x1a5   :  { %v1205_v54 = vpack.c.bf16 %v1203_v16, %v1201_v14  ;;  %v1206_v37 = vpack.c.bf16 %v1204_v17, %v1202_v15 }
 0x1a7   :  { %1347 = vmatmul.bf16.vlgmr.msra.gmra.mxu1 %v1205_v54  ;;  %1361 = vmatmul.bf16.vlgmr.msra.gmra.mxu3 %v1206_v37 }
 0x224   :  { %v1348_v63 = vpop.f32.mrf.mxu1 }
 0x225   :  { %v1349_v60 = vadd.f32 %v2194_v18, %v1348_v63 }
 0x22a   :  { %v1362_v48 = vpop.f32.mrf.mxu3 }
 0x22b   :  { %v1363_v19 = vadd.f32 %v1362_v48, %v1349_v60 }
 0x22c   :  { %v1350_v21 = vpop.f32.mrf.mxu1 }
 0x22d   :  { %v1370_v20 = vsel %vm1369_vm1, %v1363_v19, -1e+30  ;;  %v1351_v22 = vadd.f32 %v2194_v18, %v1350_v21 }
 0x22e   :  { %1372 = vmax.xlane.f32.xlu0 %v1370_v20 }
 0x232   :  { %v1364_v23 = vpop.f32.mrf.mxu3 }
 0x233   :  { %v1365_v24 = vadd.f32 %v1364_v23, %v1351_v22 }
 0x235   :  { %v1371_v46 = vsel %vm1369_vm1, %v1365_v24, -1e+30 }
 0x236   :  { %1374 = vmax.xlane.f32.xlu0 %v1371_v46 }
 0x2a1   :  { %v1373_v25 = vpop.xlane.xlu0 %1372 }
 0x2a2   :  { %v1376_v26 = vsub.f32 %v1370_v20, %v1373_v25 }
 0x2a4   :  { %v1378_v27 = vmul.f32 1.442695, %v1376_v26 }
 0x2a6   :  { %2195 = vpow2.f32 %v1378_v27 }
 0x2a9   :  { %v1375_v28 = vpop.xlane.xlu0 %1374 }
 0x2aa   :  { %v1377_v29 = vsub.f32 %v1371_v46, %v1375_v28 }
 0x2ac   :  { %v2196_v30 = vpop.eup %2195  ;;  %v1380_v31 = vmul.f32 1.442695, %v1377_v29 }
 0x2ad   :  { %1382 = vadd.xlane.f32.xlu1 %v2196_v30 }
 0x2ae   :  { %2197 = vpow2.f32 %v1380_v31 }
 0x2b4   :  { %v2198_v32 = vpop.eup %2197 }
 0x2b5   :  { %1384 = vadd.xlane.f32.xlu1 %v2198_v32 }
 0x320   :  { %v1383_v33 = vpop.xlane.xlu1 %1382 }
 0x321   :  { %2199 = vlog2.f32 %v1383_v33 }
 0x327   :  { %v2200_v34 = vpop.eup %2199 }
 0x328   :  { %v1387_v35 = vmul.f32 0.6931472, %v2200_v34  ;;  %v1385_v36 = vpop.xlane.xlu1 %1384 }
 0x329   :  { %2201 = vlog2.f32 %v1385_v36 }
 0x32a   :  { %v1390_v38 = vsub.f32 %v1376_v26, %v1387_v35 }
 0x32c   :  { %1392 = vst [vmem:[#allocation11] sm:$0xff] %v1390_v38 }
 0x32f   :  { %v2202_v39 = vpop.eup %2201 }
 0x330   :  { %v1389_v40 = vmul.f32 0.6931472, %v2202_v39 }
 0x332   :  { %v1391_v41 = vsub.f32 %v1377_v29, %v1389_v40 }
 0x334   :  { %1393 = vst [vmem:[#allocation11 + $0x8] sm:$0xff] %v1391_v41 }
 0x335   :  { %1406 = dma.vmem_to_hbm [thread:$0]  %s1399_s30, 256, %s1401_s12, [#allocation4], %s2356_s9, %s2356_s9, %s2357_s10  }
 0x336   :  { %2353 = dma.done.wait [#allocation4], 256  }
 0x337   :  { %2354 = vsyncadd [#allocation4], 4294967040 }
 0x338   :  { %1411 = vsyncpa [#allocation3], 1 }
 0x339   :  { %1412 = vsyncpa [#allocation6], 1 }
 0x33a   :  { %1413 = vsyncpa [#allocation9], 1 }
 0x33b   :  { %1414 = vsyncpa [#allocation4], 1 }

</bundles_post_ra>
